<compile_context>
chip_gen: v6e
topology: v6e:2x2x1
jax: 0.10.0
libtpu: 0.0.40
codegen_flags: <defaults>
</compile_context>

<pallas_src>
import functools

import jax
import jax.numpy as jnp
from jax.experimental import pallas as pl
from jax.experimental.pallas import tpu as pltpu


def _accuracy_kernel(pred_ref, label_ref, out_ref, *, batch: int, block_rows: int):
    i = pl.program_id(0)

    pred = pred_ref[...]     # (TB, C)
    label = label_ref[...]   # (TB, C)
    # Widen sub-32-bit inputs in VMEM (free in this DMA-bound kernel; keeps the
    # compare/select chain safe on v5e, which has no bf16 VALU).  On v6e/v7x the
    # convert is hidden under the DMA anyway.
    if pred.dtype.itemsize < 4:
        pred = pred.astype(jnp.float32)
    if label.dtype.itemsize < 4:
        label = label.astype(jnp.float32)

    tb, c = pred.shape
    col = jax.lax.broadcasted_iota(jnp.int32, (tb, c), 1)

    # argmax along lanes with first-occurrence tie-break (max -> equal -> min idx),
    # matching jnp.argmax / torch.argmax for finite inputs.
    p_max = jnp.max(pred, axis=-1, keepdims=True)
    p_idx = jnp.min(jnp.where(pred == p_max, col, c), axis=-1, keepdims=True)   # (TB, 1)
    l_max = jnp.max(label, axis=-1, keepdims=True)
    l_idx = jnp.min(jnp.where(label == l_max, col, c), axis=-1, keepdims=True)  # (TB, 1)

    # Mask rows beyond the true batch (last partial tile reads padded rows).
    row = i * block_rows + jax.lax.broadcasted_iota(jnp.int32, (tb, 1), 0)
    valid = row < batch
    matches = jnp.where(jnp.logical_and(valid, p_idx == l_idx), 1.0, 0.0)       # (TB, 1)

    # Per-tile partial count, splatted across a lane-dense 128-wide output block.
    count = jnp.sum(matches)
    out_ref[...] = jnp.full(out_ref.shape, count, dtype=out_ref.dtype)


def _sublane_multiple(itemsize: int) -> int:
    # Native VMEM sublane tiling: f32 (8,128), bf16/f16 (16,128), int8/fp8 (32,128).
    return {4: 8, 2: 16, 1: 32}.get(itemsize, 8)


def accuracy(prediction: jax.Array, label: jax.Array, *, block_rows=None) -> jax.Array:
    """prediction, label: [batch, n_classes] (any float dtype). Returns scalar f32 accuracy."""
    assert prediction.shape == label.shape and prediction.ndim == 2
    B, C = prediction.shape

    p_item = jnp.dtype(prediction.dtype).itemsize
    l_item = jnp.dtype(label.dtype).itemsize
    sub = max(_sublane_multiple(p_item), _sublane_multiple(l_item))

    # Lane-padded VMEM model per tile row: the two inputs are double-buffered by the
    # pipeline, and the compare/select/reduce chain materialises a handful of f32
    # (tb, C_pad) / (tb, 1->128) intermediates.  Budget conservatively so the tile
    # fits on all generations, including v7x (64 MiB VMEM).
    c_pad = -(-C // 128) * 128
    model_row_bytes = 2 * c_pad * (p_item + l_item) + 14 * c_pad * 4
    vmem_budget = 32 * 1024 * 1024
    max_rows = max(sub, (vmem_budget // model_row_bytes) // sub * sub)

    if block_rows is None:
        tb = max_rows
        # If the whole batch would fit one tile but is still sizeable, split it in
        # two so both TensorCores (v7x megacore, "parallel" grid axis) get work.
        if 2048 <= B <= tb:
            half = -(-B // 2)
            tb = min(tb, -(-half // sub) * sub)
    else:
        tb = max(sub, (min(int(block_rows), max_rows) // sub) * sub)
    if tb >= B:
        tb = B   # a single full-extent block is always a legal block shape

    num_tiles = pl.cdiv(B, tb)

    needed_vmem = tb * model_row_bytes + (4 << 20)
    vmem_limit = int(min(max(needed_vmem, 16 << 20), 48 << 20))

    kernel = functools.partial(_accuracy_kernel, batch=B, block_rows=tb)

    partial_counts = pl.pallas_call(
        kernel,
        out_shape=jax.ShapeDtypeStruct((num_tiles, 1, 128), jnp.float32),
        grid_spec=pltpu.PrefetchScalarGridSpec(
            num_scalar_prefetch=0,
            grid=(num_tiles,),
            in_specs=[
                pl.BlockSpec((tb, C), lambda i: (i, 0)),
                pl.BlockSpec((tb, C), lambda i: (i, 0)),
            ],
            out_specs=pl.BlockSpec((1, 1, 128), lambda i: (i, 0, 0)),
        ),
        compiler_params=pltpu.CompilerParams(
            dimension_semantics=("parallel",),   # embarrassingly parallel over tiles
            vmem_limit_bytes=vmem_limit,
        ),
        cost_estimate=pl.CostEstimate(
            flops=6 * B * C,
            transcendentals=0,
            bytes_accessed=B * C * (p_item + l_item) + num_tiles * 512,
        ),
    )(prediction, label)

    # Tiny cross-tile reduction (at most a few hundred floats) done in XLA.
    return jnp.sum(partial_counts[:, 0, 0]) / B


def _reference(prediction, label):
    return jnp.mean(
        (jnp.argmax(prediction, axis=-1) == jnp.argmax(label, axis=-1)).astype(jnp.float32)
    )


if __name__ == "__main__":
    key = jax.random.PRNGKey(0)
    k1, k2, k3, k4, k5, k6 = jax.random.split(key, 6)

    # Case 1: small shape matching the module spec (single full tile, f32).
    batch, n_classes = 8, 5
    prediction = jax.random.normal(k1, (batch, n_classes), dtype=jnp.float32)
    label = jax.nn.one_hot(
        jax.random.randint(k2, (batch,), 0, n_classes), n_classes, dtype=jnp.float32)
    acc = accuracy(prediction, label)
    jax.block_until_ready(acc)
    ref = _reference(prediction, label)
    assert jnp.allclose(acc, ref), (acc, ref)

    # Case 2: batch-tiled parallel grid with a partial, masked last tile and
    # native bf16 inputs (50 rows, 16-row tiles -> 4 grid steps).
    batch2, n_classes2 = 50, 5
    prediction2 = jax.random.normal(k3, (batch2, n_classes2), dtype=jnp.bfloat16)
    label2 = jax.nn.one_hot(
        jax.random.randint(k4, (batch2,), 0, n_classes2), n_classes2, dtype=jnp.bfloat16)
    acc2 = accuracy(prediction2, label2, block_rows=16)
    jax.block_until_ready(acc2)
    ref2 = _reference(prediction2.astype(jnp.float32), label2.astype(jnp.float32))
    assert jnp.allclose(acc2, ref2), (acc2, ref2)

    # Case 3: automatic tile sizing + 2-way split path (f32, 2 tiles, masked tail).
    batch3, n_classes3 = 3000, 7
    prediction3 = jax.random.normal(k5, (batch3, n_classes3), dtype=jnp.float32)
    label3 = jax.nn.one_hot(
        jax.random.randint(k6, (batch3,), 0, n_classes3), n_classes3, dtype=jnp.float32)
    acc3 = accuracy(prediction3, label3)
    jax.block_until_ready(acc3)
    ref3 = _reference(prediction3, label3)
    assert jnp.allclose(acc3, ref3), (acc3, ref3)

    print("KERNEL_OK")
</pallas_src>

<mosaic_0001>
module attributes {stable_mosaic.version = 11 : i64} {
  func.func @_accuracy_kernel(%arg0: i32, %arg1: memref<8x5xf32, #tpu.memory_space<vmem>>, %arg2: memref<8x5xf32, #tpu.memory_space<vmem>>, %arg3: memref<1x1x128xf32, #tpu.memory_space<vmem>>) attributes {dimension_semantics = [#tpu.dimension_semantics<parallel>], iteration_bounds = array<i64: 1>, scalar_prefetch = 0 : i64, scratch_operands = 0 : i64, tpu.core_type = #tpu.core_type<tc>, window_params = [{transform_indices = @transform_0, window_bounds = array<i64: 8, 5>}, {transform_indices = @transform_1, window_bounds = array<i64: 8, 5>}, {transform_indices = @transform_2, window_bounds = array<i64: 1, 1, 128>}]} {
    %c0 = arith.constant 0 : index
    %c0_0 = arith.constant 0 : index
    %0 = vector.load %arg1[%c0, %c0_0] : memref<8x5xf32, #tpu.memory_space<vmem>>, vector<8x5xf32>
    %c0_1 = arith.constant 0 : index
    %c0_2 = arith.constant 0 : index
    %1 = vector.load %arg2[%c0_1, %c0_2] : memref<8x5xf32, #tpu.memory_space<vmem>>, vector<8x5xf32>
    %2 = tpu.iota {dimensions = array<i32: 1>} : vector<8x5xi32>
    %cst = arith.constant dense<0xFF800000> : vector<8xf32>
    %3 = vector.multi_reduction <maximumf>, %0, %cst [1] : vector<8x5xf32> to vector<8xf32>
    %4 = vector.shape_cast %3 : vector<8xf32> to vector<8x1xf32>
    %5 = vector.broadcast %4 : vector<8x1xf32> to vector<8x5xf32>
    %6 = arith.cmpf oeq, %0, %5 : vector<8x5xf32>
    %c5_i32 = arith.constant 5 : i32
    %7 = vector.broadcast %c5_i32 : i32 to vector<8x5xi32>
    %8 = arith.select %6, %2, %7 : vector<8x5xi1>, vector<8x5xi32>
    %cst_3 = arith.constant dense<2147483647> : vector<8xi32>
    %9 = vector.multi_reduction <minsi>, %8, %cst_3 [1] : vector<8x5xi32> to vector<8xi32>
    %10 = vector.shape_cast %9 : vector<8xi32> to vector<8x1xi32>
    %cst_4 = arith.constant dense<0xFF800000> : vector<8xf32>
    %11 = vector.multi_reduction <maximumf>, %1, %cst_4 [1] : vector<8x5xf32> to vector<8xf32>
    %12 = vector.shape_cast %11 : vector<8xf32> to vector<8x1xf32>
    %13 = vector.broadcast %12 : vector<8x1xf32> to vector<8x5xf32>
    %14 = arith.cmpf oeq, %1, %13 : vector<8x5xf32>
    %c5_i32_5 = arith.constant 5 : i32
    %15 = vector.broadcast %c5_i32_5 : i32 to vector<8x5xi32>
    %16 = arith.select %14, %2, %15 : vector<8x5xi1>, vector<8x5xi32>
    %cst_6 = arith.constant dense<2147483647> : vector<8xi32>
    %17 = vector.multi_reduction <minsi>, %16, %cst_6 [1] : vector<8x5xi32> to vector<8xi32>
    %18 = vector.shape_cast %17 : vector<8xi32> to vector<8x1xi32>
    %c8_i32 = arith.constant 8 : i32
    %19 = arith.muli %arg0, %c8_i32 : i32
    %20 = tpu.iota {dimensions = array<i32: 0>} : vector<8x1xi32>
    %21 = vector.broadcast %19 : i32 to vector<8x1xi32>
    %22 = arith.addi %21, %20 : vector<8x1xi32>
    %c8_i32_7 = arith.constant 8 : i32
    %23 = vector.broadcast %c8_i32_7 : i32 to vector<8x1xi32>
    %24 = arith.cmpi slt, %22, %23 : vector<8x1xi32>
    %25 = arith.cmpi eq, %10, %18 : vector<8x1xi32>
    %26 = arith.andi %24, %25 : vector<8x1xi1>
    %cst_8 = arith.constant 1.000000e+00 : f32
    %cst_9 = arith.constant 0.000000e+00 : f32
    %27 = vector.broadcast %cst_8 : f32 to vector<8x1xf32>
    %28 = vector.broadcast %cst_9 : f32 to vector<8x1xf32>
    %29 = arith.select %26, %27, %28 : vector<8x1xi1>, vector<8x1xf32>
    %30 = vector.shape_cast %29 : vector<8x1xf32> to vector<1x8x1xf32>
    %cst_10 = arith.constant dense<0.000000e+00> : vector<1xf32>
    %31 = vector.multi_reduction <add>, %30, %cst_10 [1, 2] : vector<1x8x1xf32> to vector<1xf32>
    %32 = vector.shape_cast %31 : vector<1xf32> to vector<1x1x1xf32>
    %33 = vector.extract %32[0, 0, 0] : f32 from vector<1x1x1xf32>
    %34 = vector.broadcast %33 : f32 to vector<1x1x128xf32>
    %c0_11 = arith.constant 0 : index
    %c0_12 = arith.constant 0 : index
    %c0_13 = arith.constant 0 : index
    %35 = vector.load %arg3[%c0_11, %c0_12, %c0_13] : memref<1x1x128xf32, #tpu.memory_space<vmem>>, vector<1x1x128xf32>
    tpu.vector_store %arg3[%c0_11, %c0_12, %c0_13], %34 {strides = array<i32>} : memref<1x1x128xf32, #tpu.memory_space<vmem>>, vector<1x1x128xf32>,
    return
  }
  func.func @transform_0(%arg0: i32) -> (i32, i32) {
    %c0_i32 = arith.constant 0 : i32
    %c0_i32_0 = arith.constant 0 : i32
    return %arg0, %c0_i32 : i32, i32
  }
  func.func @transform_1(%arg0: i32) -> (i32, i32) {
    %c0_i32 = arith.constant 0 : i32
    %c0_i32_0 = arith.constant 0 : i32
    return %arg0, %c0_i32 : i32, i32
  }
  func.func @transform_2(%arg0: i32) -> (i32, i32, i32) {
    %c0_i32 = arith.constant 0 : i32
    %c0_i32_0 = arith.constant 0 : i32
    %c0_i32_1 = arith.constant 0 : i32
    return %arg0, %c0_i32, %c0_i32_0 : i32, i32, i32
  }
}

</mosaic_0001>

<bundles_post_ra>
// kernel: tpu_custom_call.1
= control target key start
LH: loop header
LB: loop body
LE: loop exit
PB: predicated region body
PF: predicated region fallthrough
CT: control target
= control target key end

     0   :  { %7 = vsyncpa [#allocation3], 0  ;;  %s223_s0 = inlined_call_operand.hbm [shape: f32[8,5], index: 0, kind: input, shape index: {}]   ;;  %s224_s1 = inlined_call_operand.hbm [shape: f32[8,5], index: 1, kind: input, shape index: {}]   ;;  %s225_s2 = inlined_call_operand.hbm [shape: f32[1,1,128], index: 2, kind: output, shape index: {}]  }
   0x1   :  { %8 = vsyncpa [#allocation6], 0 }
   0x2   :  { %9 = vsyncpa [#allocation4], 0  ;;  %s191_s9 = smov [#allocation2]   ;;  %s192_s11 = smov [#allocation5]  }
   0x3   :  { %s16_s10 = sshll.u32 %s191_s9, 4  ;;  %s26_s12 = sshll.u32 %s192_s11, 4  ;;  %s17_s10 = int_to_ptr.vmem [resolvable:$true] %s16_s10  ;;  %s27_s12 = int_to_ptr.vmem [resolvable:$true] %s26_s12 }
   0x4   :  { %s133_s13 = scalar_lea.vmem %s17_s10, 128  ;;  %p138_p1 = scmp.lt.s32.totalorder %s17_s10, %s17_s10 }
   0x5   :  { %p134_p0 = scmp.ne.s32.totalorder %s17_s10, %s133_s13  ;;  %p139_p2 = scmp.lt.s32.totalorder %s133_s13, %s133_s13 }
   0x7   :  { %p140_p3 = por %p139_p2, %p138_p1 }
   0x9   :  { %p141_p4 = pnand %p140_p3, %p134_p0 }
   0xb   :  { %144 = shalt.err (!%p141_p4)
}
   0xc   :  { %19 = dma.hbm_to_vmem [thread:$0]  %s223_s0, 128, %s17_s10, [#allocation3]  }
   0xd   :  { %s153_s16 = scalar_lea.vmem %s27_s12, 128  ;;  %p158_p6 = scmp.lt.s32.totalorder %s27_s12, %s27_s12 }
   0xe   :  { %p154_p5 = scmp.ne.s32.totalorder %s27_s12, %s153_s16  ;;  %p159_p7 = scmp.lt.s32.totalorder %s153_s16, %s153_s16 }
  0x10   :  { %p160_p8 = por %p159_p7, %p158_p6 }
  0x12   :  { %p161_p9 = pnand %p160_p8, %p154_p5 }
  0x14   :  { %164 = shalt.err (!%p161_p9)
}
  0x15   :  { %29 = dma.hbm_to_vmem [thread:$0]  %s224_s1, 128, %s27_s12, [#allocation6]  }
  0x16   :  { %185 = dma.done.wait [#allocation3], 128  }
  0x17   :  { %186 = vsyncadd [#allocation3], 4294967168 }
  0x18   :  { %187 = dma.done.wait [#allocation6], 128  }
  0x19   :  { %188 = vsyncadd [#allocation6], 4294967168  ;;  %vm40_vm0 = vcmask 39936   ;;  %v36_v0 = vld [vmem:[#allocation2] sm:$0xff]  ;;  %v37_v1 = vld [vmem:[#allocation5] sm:$0xff]  ;;  %v38_v4 = vlaneseq  ;;  %vm90_vm5 = vcmask 7168  }
  0x1a   :  { %v41_v2 = vsel %vm40_vm0, %v36_v0, -inf  ;;  %v61_v3 = vsel %vm40_vm0, %v37_v1, -inf  ;;  %v193_v34 = vmov 0.0   ;;  %s194_s0 = smov [#allocation7]  }
  0x1b   :  { %42 = vmax.xlane.f32.xlu0 %v41_v2  ;;  %v39_v5 = vand.u32 127, %v38_v4  ;;  %s109_s1 = sshll.u32 %s194_s0, 4  ;;  %s110_s1 = int_to_ptr.vmem [resolvable:$true] %s109_s1 }
  0x1c   :  { %s165_s20 = scalar_lea.vmem %s110_s1, 16  ;;  %s169_s21 = scalar_lea.vmem %s110_s1, 32 }
  0x1d   :  { %p166_p10 = scmp.ne.s32.totalorder %s110_s1, %s165_s20  ;;  %p170_p11 = scmp.lt.s32.totalorder %s110_s1, %s110_s1 }
  0x1e   :  { %p171_p12 = scmp.lt.s32.totalorder %s169_s21, %s165_s20 }
  0x1f   :  { %62 = vmax.xlane.f32.xlu0 %v61_v3 }
  0x20   :  { %p172_p13 = por %p171_p12, %p170_p11 }
  0x22   :  { %p173_p0 = pnand %p172_p13, %p166_p10 }
  0xa4   :  { %v43_v6 = vpop.xlane.xlu0 %42 }
  0xa5   :  { %vm44_vm1 = vcmp.eq.f32.partialorder %v36_v0, %v43_v6 }
  0xa6   :  { %v45_v7 = vsel %vm44_vm1, %v39_v5, 5 }
  0xa7   :  { %v46_v8 = vsel %vm40_vm0, %v45_v7, 2147483647 }
  0xa8   :  { %v63_v9 = vpop.xlane.xlu0 %62  ;;  %v48_v10 = vshra.s32 %v46_v8, 16  ;;  %v47_v16 = vand.u32 65535, %v46_v8 }
  0xa9   :  { %vm64_vm2 = vcmp.eq.f32.partialorder %v37_v1, %v63_v9 }
  0xaa   :  { %v65_v11 = vsel %vm64_vm2, %v39_v5, 5  ;;  %v50_v12 = vcvt.s32.f32 %v48_v10  ;;  %v49_v18 = vcvt.s32.f32 %v47_v16 }
  0xab   :  { %v66_v13 = vsel %vm40_vm0, %v65_v11, 2147483647 }
  0xac   :  { %51 = vmin.xlane.f32.xlu1 %v50_v12  ;;  %v68_v14 = vshra.s32 %v66_v13, 16  ;;  %v67_v19 = vand.u32 65535, %v66_v13 }
  0xae   :  { %v70_v15 = vcvt.s32.f32 %v68_v14  ;;  %v69_v22 = vcvt.s32.f32 %v67_v19 }
  0xb0   :  { %71 = vmin.xlane.f32.xlu1 %v70_v15 }
 0x135   :  { %v52_v17 = vpop.xlane.xlu1 %51 }
 0x136   :  { %vm53_vm3 = vcmp.eq.f32.partialorder %v50_v12, %v52_v17  ;;  %v58_v25 = vcvt.f32.s32 %v52_v17 }
 0x137   :  { %v54_v20 = vsel %vm53_vm3, %v49_v18, inf }
 0x138   :  { %55 = vmin.xlane.f32.xlu0 %v54_v20  ;;  %v59_v29 = vshll.u32 %v58_v25, 16 }
 0x139   :  { %v72_v21 = vpop.xlane.xlu1 %71 }
 0x13a   :  { %vm73_vm4 = vcmp.eq.f32.partialorder %v70_v15, %v72_v21  ;;  %v78_v26 = vcvt.f32.s32 %v72_v21 }
 0x13b   :  { %v74_v23 = vsel %vm73_vm4, %v69_v22, inf }
 0x13c   :  { %75 = vmin.xlane.f32.xlu1 %v74_v23  ;;  %v79_v30 = vshll.u32 %v78_v26, 16 }
 0x1c1   :  { %v56_v24 = vpop.xlane.xlu0 %55 }
 0x1c2   :  { %v57_v27 = vcvt.f32.s32 %v56_v24 }
 0x1c4   :  { %v60_v32 = vadd.s32 %v59_v29, %v57_v27 }
 0x1c5   :  { %v76_v28 = vpop.xlane.xlu1 %75 }
 0x1c6   :  { %v77_v31 = vcvt.f32.s32 %v76_v28 }
 0x1c8   :  { %v80_v33 = vadd.s32 %v79_v30, %v77_v31 }
 0x1ca   :  { %vm87_vm6 = vcmp.eq.s32.totalorder %v60_v32, %v80_v33 }
 0x1cb   :  { %v89_v35 = vsel %vm87_vm6, 1.0, %v193_v34 }
 0x1cc   :  { %v91_v36 = vsel %vm90_vm5, %v89_v35, 0.0 }
 0x1cd   :  { %92 = vadd.xlane.f32.xlu0 %v91_v36 }
 0x256   :  { %v93_v37 = vpop.xlane.xlu0 %92 }
 0x257   :  { %v94_v38 = vrot.slane %v93_v37, 4 }
 0x259   :  { %v95_v39 = vadd.f32 %v94_v38, %v93_v37 }
 0x25b   :  { %v96_v40 = vrot.slane %v95_v39, 2 }
 0x25d   :  { %v97_v41 = vadd.f32 %v96_v40, %v95_v39 }
 0x25f   :  { %v98_v42 = vrot.slane %v97_v41, 1 }
 0x261   :  { %v99_v43 = vadd.f32 %v98_v42, %v97_v41 }
 0x263   :  { %119 = vpush %v99_v43 }
 0x294   :  { %s120_s19 = spop %119 }
 0x295   :  { %v101_v44 = vstv %s120_s19 }
 0x296   :  { %102 = vst [vmem:[#allocation7] sm:$0x1] %v101_v44 }
 0x297   :  { %176 = shalt.err (!%p173_p0)
}
 0x298   :  { %112 = dma.vmem_to_hbm [thread:$0]  %s110_s1, 16, %s225_s2, [#allocation4]  }
 0x299   :  { %189 = dma.done.wait [#allocation4], 16  }
 0x29a   :  { %190 = vsyncadd [#allocation4], 4294967280 }
 0x29b   :  { %116 = vsyncpa [#allocation3], 1 }
 0x29c   :  { %117 = vsyncpa [#allocation6], 1 }
 0x29d   :  { %118 = vsyncpa [#allocation4], 1 }

</bundles_post_ra>
